<compile_context>
chip_gen: v7x
topology: tpu7x:2x2x1
jax: 0.10.0
libtpu: 0.0.40
codegen_flags: <defaults>
</compile_context>

<pallas_src>
import functools

import jax
import jax.numpy as jnp
from jax.experimental import pallas as pl
from jax.experimental.pallas import tpu as pltpu

EPS = 1e-5


def _bn_train(h, gamma, beta):
    """Training-mode BatchNorm1d with hoisted centering and fused scale."""
    mu = jnp.mean(h, axis=0, keepdims=True)
    c = h - mu                                        # reused for var and normalize
    var = jnp.mean(c * c, axis=0, keepdims=True)      # biased batch variance
    scale = gamma * jax.lax.rsqrt(var + EPS)          # gamma folded into rsqrt scale
    return c * scale + beta


def autoenc_kernel(hidden_dim, input_dim,
                   x_ref,
                   w_enc1_ref, b_enc1_ref, g1_ref, be1_ref,   # fused [w1 | wer]
                   w2_ref, b2_ref,
                   w_dec1_ref, b_dec1_ref, g2_ref, be2_ref,   # fused [w3 | wdr | wc]
                   w4_ref, b4_ref,
                   xhat_ref, y_ref):
    H, D = hidden_dim, input_dim
    mm_dtype = w_enc1_ref.dtype     # f32 or bf16; accumulation is always f32

    x = x_ref[...]

    # ---- fused encoder matmul: x @ [w1 | wer]  (one MXU pass instead of two) ----
    m1 = jnp.dot(x.astype(mm_dtype), w_enc1_ref[...],
                 preferred_element_type=jnp.float32) + b_enc1_ref[...]
    h1 = jnp.maximum(m1[:, :H], 0.0)          # fc_encoder[0] + ReLU
    res_enc = m1[:, H:2 * H]                  # enc_res_layer

    h1n = _bn_train(h1, g1_ref[...], be1_ref[...])
    fc_enc = jnp.dot(h1n.astype(mm_dtype), w2_ref[...],
                     preferred_element_type=jnp.float32) + b2_ref[...]
    x_enc = jnp.tanh(fc_enc + res_enc)

    # ---- fused decoder/classifier matmul: x_enc @ [w3 | wdr | wc] ----
    m3 = jnp.dot(x_enc.astype(mm_dtype), w_dec1_ref[...],
                 preferred_element_type=jnp.float32) + b_dec1_ref[...]
    h2 = jnp.maximum(m3[:, :H], 0.0)          # fc_decoder[0] + ReLU
    res_dec = m3[:, H:H + D]                  # dec_res_layer
    y_ref[...] = m3[:, H + D:H + D + 1]       # classifier head (fused, no N=1 matmul)

    h2n = _bn_train(h2, g2_ref[...], be2_ref[...])
    fc_dec = jnp.dot(h2n.astype(mm_dtype), w4_ref[...],
                     preferred_element_type=jnp.float32) + b4_ref[...]
    xhat_ref[...] = fc_dec + res_dec


FUSED_ORDER = ["w_enc1", "b_enc1", "g1", "be1", "w2", "b2",
               "w_dec1", "b_dec1", "g2", "be2", "w4", "b4"]


def pack_params(p, matmul_dtype=jnp.float32):
    """Wrapper-side weight fusion: concat shared-LHS weights on the output axis.

    Only matmul operands are cast to `matmul_dtype`; biases / BN affine params
    stay f32 so all non-MXU math runs in f32.
    """
    return {
        "w_enc1": jnp.concatenate([p["w1"], p["wer"]], axis=1).astype(matmul_dtype),
        "b_enc1": jnp.concatenate([p["b1"], p["ber"]], axis=1),
        "g1": p["g1"], "be1": p["be1"],
        "w2": p["w2"].astype(matmul_dtype), "b2": p["b2"],
        "w_dec1": jnp.concatenate([p["w3"], p["wdr"], p["wc"]], axis=1).astype(matmul_dtype),
        "b_dec1": jnp.concatenate([p["b3"], p["bdr"], p["bc"]], axis=1),
        "g2": p["g2"], "be2": p["be2"],
        "w4": p["w4"].astype(matmul_dtype), "b4": p["b4"],
    }


def autoencoder_classifier_forward(x, fused):
    """Whole forward pass in one Pallas kernel (everything fits VMEM)."""
    B, input_dim = x.shape
    hidden_dim = fused["g1"].shape[-1]
    vmem = pl.BlockSpec(memory_space=pltpu.MemorySpace.VMEM)
    args = [x] + [fused[k] for k in FUSED_ORDER]
    kernel = functools.partial(autoenc_kernel, hidden_dim, input_dim)
    x_hat, y = pl.pallas_call(
        kernel,
        out_shape=(jax.ShapeDtypeStruct((B, input_dim), jnp.float32),
                   jax.ShapeDtypeStruct((B, 1), jnp.float32)),
        in_specs=[vmem] * len(args),
        out_specs=(vmem, vmem),
        compiler_params=pltpu.CompilerParams(vmem_limit_bytes=32 * 1024 * 1024),
    )(*args)
    return x_hat, jnp.squeeze(y, axis=-1)   # y.squeeze() as in the PyTorch module


def init_params(key, input_dim, hidden_dim):
    """Deterministic PyTorch-style uniform init; weights stored as (in, out)."""
    def linear(k, fan_in, fan_out):
        kw, kb = jax.random.split(k)
        bound = 1.0 / jnp.sqrt(fan_in)
        w = jax.random.uniform(kw, (fan_in, fan_out), jnp.float32, -bound, bound)
        b = jax.random.uniform(kb, (1, fan_out), jnp.float32, -bound, bound)
        return w, b

    keys = jax.random.split(key, 7)
    p = {}
    p["w1"], p["b1"] = linear(keys[0], input_dim, hidden_dim)      # fc_encoder[0]
    p["g1"] = jnp.ones((1, hidden_dim), jnp.float32)               # BatchNorm1d gamma
    p["be1"] = jnp.zeros((1, hidden_dim), jnp.float32)             # BatchNorm1d beta
    p["w2"], p["b2"] = linear(keys[1], hidden_dim, hidden_dim)     # fc_encoder[3]
    p["wer"], p["ber"] = linear(keys[2], input_dim, hidden_dim)    # enc_res_layer
    p["w3"], p["b3"] = linear(keys[3], hidden_dim, hidden_dim)     # fc_decoder[0]
    p["g2"] = jnp.ones((1, hidden_dim), jnp.float32)
    p["be2"] = jnp.zeros((1, hidden_dim), jnp.float32)
    p["w4"], p["b4"] = linear(keys[4], hidden_dim, input_dim)      # fc_decoder[3]
    p["wdr"], p["bdr"] = linear(keys[5], hidden_dim, input_dim)    # dec_res_layer
    p["wc"], p["bc"] = linear(keys[6], hidden_dim, 1)              # classifier
    return p


def reference_forward(x, p):
    """Pure-JAX reference (mirrors PyTorch training-mode semantics)."""
    def bn(h, g, b):
        mu = jnp.mean(h, axis=0, keepdims=True)
        var = jnp.mean((h - mu) ** 2, axis=0, keepdims=True)
        return (h - mu) / jnp.sqrt(var + EPS) * g + b

    h1 = jnp.maximum(x @ p["w1"] + p["b1"], 0.0)
    fc_enc = bn(h1, p["g1"], p["be1"]) @ p["w2"] + p["b2"]
    res_enc = x @ p["wer"] + p["ber"]
    x_enc = jnp.tanh(fc_enc + res_enc)
    y = x_enc @ p["wc"] + p["bc"]
    h2 = jnp.maximum(x_enc @ p["w3"] + p["b3"], 0.0)
    fc_dec = bn(h2, p["g2"], p["be2"]) @ p["w4"] + p["b4"]
    res_dec = x_enc @ p["wdr"] + p["bdr"]
    return fc_dec + res_dec, jnp.squeeze(y, axis=-1)


if __name__ == "__main__":
    B, INPUT_DIM, HIDDEN_DIM = 8, 16, 32

    key = jax.random.PRNGKey(0)
    kx, kp = jax.random.split(key)
    x = jax.random.normal(kx, (B, INPUT_DIM), jnp.float32)
    params = init_params(kp, INPUT_DIM, HIDDEN_DIM)

    fwd = jax.jit(autoencoder_classifier_forward)

    # f32 matmul path — must match the f32 reference tightly.
    fused_f32 = pack_params(params, jnp.float32)
    x_hat, y = fwd(x, fused_f32)
    jax.block_until_ready((x_hat, y))

    x_hat_ref, y_ref = reference_forward(x, params)
    assert x_hat.shape == (B, INPUT_DIM) and y.shape == (B,)
    assert jnp.allclose(x_hat, x_hat_ref, atol=1e-4, rtol=1e-4)
    assert jnp.allclose(y, y_ref, atol=1e-4, rtol=1e-4)

    # bf16 matmul-operand path (f32 accumulation) — the review's DMA/MXU saving;
    # checked for shape/finiteness only since bf16 rounding drifts from the f32 ref.
    fused_bf16 = pack_params(params, jnp.bfloat16)
    x_hat_b, y_b = fwd(x, fused_bf16)
    jax.block_until_ready((x_hat_b, y_b))
    assert x_hat_b.shape == (B, INPUT_DIM) and y_b.shape == (B,)
    assert bool(jnp.all(jnp.isfinite(x_hat_b))) and bool(jnp.all(jnp.isfinite(y_b)))

    print("KERNEL_OK")
</pallas_src>

<mosaic_0001>
module attributes {stable_mosaic.version = 11 : i64} {
  func.func @autoenc_kernel(%arg0: memref<8x16xf32, #tpu.memory_space<vmem>>, %arg1: memref<16x64xf32, #tpu.memory_space<vmem>>, %arg2: memref<1x64xf32, #tpu.memory_space<vmem>>, %arg3: memref<1x32xf32, #tpu.memory_space<vmem>>, %arg4: memref<1x32xf32, #tpu.memory_space<vmem>>, %arg5: memref<32x32xf32, #tpu.memory_space<vmem>>, %arg6: memref<1x32xf32, #tpu.memory_space<vmem>>, %arg7: memref<32x49xf32, #tpu.memory_space<vmem>>, %arg8: memref<1x49xf32, #tpu.memory_space<vmem>>, %arg9: memref<1x32xf32, #tpu.memory_space<vmem>>, %arg10: memref<1x32xf32, #tpu.memory_space<vmem>>, %arg11: memref<32x16xf32, #tpu.memory_space<vmem>>, %arg12: memref<1x16xf32, #tpu.memory_space<vmem>>, %arg13: memref<8x16xf32, #tpu.memory_space<vmem>>, %arg14: memref<8x1xf32, #tpu.memory_space<vmem>>) attributes {dimension_semantics = [], scalar_prefetch = 0 : i64, scratch_operands = 0 : i64, tpu.core_type = #tpu.core_type<tc>} {
    %c0 = arith.constant 0 : index
    %c0_0 = arith.constant 0 : index
    %0 = vector.load %arg0[%c0, %c0_0] : memref<8x16xf32, #tpu.memory_space<vmem>>, vector<8x16xf32>
    %c0_1 = arith.constant 0 : index
    %c0_2 = arith.constant 0 : index
    %1 = vector.load %arg1[%c0_1, %c0_2] : memref<16x64xf32, #tpu.memory_space<vmem>>, vector<16x64xf32>
    %cst = arith.constant dense<0.000000e+00> : vector<8x64xf32>
    %2 = tpu.matmul %0, %1, %cst {dimension_numbers = #tpu.dot_dimension_numbers<[1], [0], [0], [1], [0, 0, 1, 1], [], []>} : vector<8x16xf32>, vector<16x64xf32>, vector<8x64xf32> -> vector<8x64xf32>
    %c0_3 = arith.constant 0 : index
    %c0_4 = arith.constant 0 : index
    %3 = vector.load %arg2[%c0_3, %c0_4] : memref<1x64xf32, #tpu.memory_space<vmem>>, vector<1x64xf32>
    %4 = vector.broadcast %3 : vector<1x64xf32> to vector<8x64xf32>
    %5 = arith.addf %2, %4 : vector<8x64xf32>
    %6 = vector.extract_strided_slice %5 {offsets = [0, 0], sizes = [8, 32], strides = [1, 1]} : vector<8x64xf32> to vector<8x32xf32>
    %cst_5 = arith.constant 0.000000e+00 : f32
    %7 = vector.broadcast %cst_5 : f32 to vector<8x32xf32>
    %8 = arith.maximumf %6, %7 : vector<8x32xf32>
    %9 = vector.extract_strided_slice %5 {offsets = [0, 32], sizes = [8, 32], strides = [1, 1]} : vector<8x64xf32> to vector<8x32xf32>
    %c0_6 = arith.constant 0 : index
    %c0_7 = arith.constant 0 : index
    %10 = vector.load %arg3[%c0_6, %c0_7] : memref<1x32xf32, #tpu.memory_space<vmem>>, vector<1x32xf32>
    %c0_8 = arith.constant 0 : index
    %c0_9 = arith.constant 0 : index
    %11 = vector.load %arg4[%c0_8, %c0_9] : memref<1x32xf32, #tpu.memory_space<vmem>>, vector<1x32xf32>
    %cst_10 = arith.constant dense<0.000000e+00> : vector<32xf32>
    %12 = vector.multi_reduction <add>, %8, %cst_10 [0] : vector<8x32xf32> to vector<32xf32>
    %13 = vector.shape_cast %12 : vector<32xf32> to vector<1x32xf32>
    %cst_11 = arith.constant 8.000000e+00 : f32
    %14 = vector.broadcast %cst_11 : f32 to vector<1x32xf32>
    %15 = arith.divf %13, %14 : vector<1x32xf32>
    %16 = vector.broadcast %15 : vector<1x32xf32> to vector<8x32xf32>
    %17 = arith.subf %8, %16 : vector<8x32xf32>
    %18 = arith.mulf %17, %17 : vector<8x32xf32>
    %cst_12 = arith.constant dense<0.000000e+00> : vector<32xf32>
    %19 = vector.multi_reduction <add>, %18, %cst_12 [0] : vector<8x32xf32> to vector<32xf32>
    %20 = vector.shape_cast %19 : vector<32xf32> to vector<1x32xf32>
    %cst_13 = arith.constant 8.000000e+00 : f32
    %21 = vector.broadcast %cst_13 : f32 to vector<1x32xf32>
    %22 = arith.divf %20, %21 : vector<1x32xf32>
    %cst_14 = arith.constant 9.99999974E-6 : f32
    %23 = vector.broadcast %cst_14 : f32 to vector<1x32xf32>
    %24 = arith.addf %22, %23 : vector<1x32xf32>
    %25 = math.rsqrt %24 : vector<1x32xf32>
    %26 = arith.mulf %10, %25 : vector<1x32xf32>
    %27 = vector.broadcast %26 : vector<1x32xf32> to vector<8x32xf32>
    %28 = arith.mulf %17, %27 : vector<8x32xf32>
    %29 = vector.broadcast %11 : vector<1x32xf32> to vector<8x32xf32>
    %30 = arith.addf %28, %29 : vector<8x32xf32>
    %c0_15 = arith.constant 0 : index
    %c0_16 = arith.constant 0 : index
    %31 = vector.load %arg5[%c0_15, %c0_16] : memref<32x32xf32, #tpu.memory_space<vmem>>, vector<32x32xf32>
    %cst_17 = arith.constant dense<0.000000e+00> : vector<8x32xf32>
    %32 = tpu.matmul %30, %31, %cst_17 {dimension_numbers = #tpu.dot_dimension_numbers<[1], [0], [0], [1], [0, 0, 1, 1], [], []>} : vector<8x32xf32>, vector<32x32xf32>, vector<8x32xf32> -> vector<8x32xf32>
    %c0_18 = arith.constant 0 : index
    %c0_19 = arith.constant 0 : index
    %33 = vector.load %arg6[%c0_18, %c0_19] : memref<1x32xf32, #tpu.memory_space<vmem>>, vector<1x32xf32>
    %34 = vector.broadcast %33 : vector<1x32xf32> to vector<8x32xf32>
    %35 = arith.addf %32, %34 : vector<8x32xf32>
    %36 = arith.addf %35, %9 : vector<8x32xf32>
    %37 = math.tanh %36 : vector<8x32xf32>
    %c0_20 = arith.constant 0 : index
    %c0_21 = arith.constant 0 : index
    %38 = vector.load %arg7[%c0_20, %c0_21] : memref<32x49xf32, #tpu.memory_space<vmem>>, vector<32x49xf32>
    %cst_22 = arith.constant dense<0.000000e+00> : vector<8x49xf32>
    %39 = tpu.matmul %37, %38, %cst_22 {dimension_numbers = #tpu.dot_dimension_numbers<[1], [0], [0], [1], [0, 0, 1, 1], [], []>} : vector<8x32xf32>, vector<32x49xf32>, vector<8x49xf32> -> vector<8x49xf32>
    %c0_23 = arith.constant 0 : index
    %c0_24 = arith.constant 0 : index
    %40 = vector.load %arg8[%c0_23, %c0_24] : memref<1x49xf32, #tpu.memory_space<vmem>>, vector<1x49xf32>
    %41 = vector.broadcast %40 : vector<1x49xf32> to vector<8x49xf32>
    %42 = arith.addf %39, %41 : vector<8x49xf32>
    %43 = vector.extract_strided_slice %42 {offsets = [0, 0], sizes = [8, 32], strides = [1, 1]} : vector<8x49xf32> to vector<8x32xf32>
    %cst_25 = arith.constant 0.000000e+00 : f32
    %44 = vector.broadcast %cst_25 : f32 to vector<8x32xf32>
    %45 = arith.maximumf %43, %44 : vector<8x32xf32>
    %46 = vector.extract_strided_slice %42 {offsets = [0, 32], sizes = [8, 16], strides = [1, 1]} : vector<8x49xf32> to vector<8x16xf32>
    %47 = vector.extract_strided_slice %42 {offsets = [0, 48], sizes = [8, 1], strides = [1, 1]} : vector<8x49xf32> to vector<8x1xf32>
    %c0_26 = arith.constant 0 : index
    %c0_27 = arith.constant 0 : index
    %48 = vector.load %arg14[%c0_26, %c0_27] : memref<8x1xf32, #tpu.memory_space<vmem>>, vector<8x1xf32>
    tpu.vector_store %arg14[%c0_26, %c0_27], %47 {strides = array<i32>} : memref<8x1xf32, #tpu.memory_space<vmem>>, vector<8x1xf32>,
    %c0_28 = arith.constant 0 : index
    %c0_29 = arith.constant 0 : index
    %49 = vector.load %arg9[%c0_28, %c0_29] : memref<1x32xf32, #tpu.memory_space<vmem>>, vector<1x32xf32>
    %c0_30 = arith.constant 0 : index
    %c0_31 = arith.constant 0 : index
    %50 = vector.load %arg10[%c0_30, %c0_31] : memref<1x32xf32, #tpu.memory_space<vmem>>, vector<1x32xf32>
    %cst_32 = arith.constant dense<0.000000e+00> : vector<32xf32>
    %51 = vector.multi_reduction <add>, %45, %cst_32 [0] : vector<8x32xf32> to vector<32xf32>
    %52 = vector.shape_cast %51 : vector<32xf32> to vector<1x32xf32>
    %cst_33 = arith.constant 8.000000e+00 : f32
    %53 = vector.broadcast %cst_33 : f32 to vector<1x32xf32>
    %54 = arith.divf %52, %53 : vector<1x32xf32>
    %55 = vector.broadcast %54 : vector<1x32xf32> to vector<8x32xf32>
    %56 = arith.subf %45, %55 : vector<8x32xf32>
    %57 = arith.mulf %56, %56 : vector<8x32xf32>
    %cst_34 = arith.constant dense<0.000000e+00> : vector<32xf32>
    %58 = vector.multi_reduction <add>, %57, %cst_34 [0] : vector<8x32xf32> to vector<32xf32>
    %59 = vector.shape_cast %58 : vector<32xf32> to vector<1x32xf32>
    %cst_35 = arith.constant 8.000000e+00 : f32
    %60 = vector.broadcast %cst_35 : f32 to vector<1x32xf32>
    %61 = arith.divf %59, %60 : vector<1x32xf32>
    %cst_36 = arith.constant 9.99999974E-6 : f32
    %62 = vector.broadcast %cst_36 : f32 to vector<1x32xf32>
    %63 = arith.addf %61, %62 : vector<1x32xf32>
    %64 = math.rsqrt %63 : vector<1x32xf32>
    %65 = arith.mulf %49, %64 : vector<1x32xf32>
    %66 = vector.broadcast %65 : vector<1x32xf32> to vector<8x32xf32>
    %67 = arith.mulf %56, %66 : vector<8x32xf32>
    %68 = vector.broadcast %50 : vector<1x32xf32> to vector<8x32xf32>
    %69 = arith.addf %67, %68 : vector<8x32xf32>
    %c0_37 = arith.constant 0 : index
    %c0_38 = arith.constant 0 : index
    %70 = vector.load %arg11[%c0_37, %c0_38] : memref<32x16xf32, #tpu.memory_space<vmem>>, vector<32x16xf32>
    %cst_39 = arith.constant dense<0.000000e+00> : vector<8x16xf32>
    %71 = tpu.matmul %69, %70, %cst_39 {dimension_numbers = #tpu.dot_dimension_numbers<[1], [0], [0], [1], [0, 0, 1, 1], [], []>} : vector<8x32xf32>, vector<32x16xf32>, vector<8x16xf32> -> vector<8x16xf32>
    %c0_40 = arith.constant 0 : index
    %c0_41 = arith.constant 0 : index
    %72 = vector.load %arg12[%c0_40, %c0_41] : memref<1x16xf32, #tpu.memory_space<vmem>>, vector<1x16xf32>
    %73 = vector.broadcast %72 : vector<1x16xf32> to vector<8x16xf32>
    %74 = arith.addf %71, %73 : vector<8x16xf32>
    %75 = arith.addf %74, %46 : vector<8x16xf32>
    %c0_42 = arith.constant 0 : index
    %c0_43 = arith.constant 0 : index
    %76 = vector.load %arg13[%c0_42, %c0_43] : memref<8x16xf32, #tpu.memory_space<vmem>>, vector<8x16xf32>
    tpu.vector_store %arg13[%c0_42, %c0_43], %75 {strides = array<i32>} : memref<8x16xf32, #tpu.memory_space<vmem>>, vector<8x16xf32>,
    return
  }
}

</mosaic_0001>

<bundles_post_ra>
// kernel: autoencoder_classifier_forward.1
= control target key start
LH: loop header
LB: loop body
LE: loop exit
PB: predicated region body
PF: predicated region fallthrough
CT: control target
= control target key end

     0   :  { %20 = vsyncpa [#allocation3], 0  ;;  %s1190_s0 = inlined_call_operand.hbm [shape: f32[8,16], index: 0, kind: input, shape index: {}]   ;;  %s1191_s1 = inlined_call_operand.hbm [shape: f32[16,64], index: 1, kind: input, shape index: {}]   ;;  %s1192_s2 = inlined_call_operand.vmem [shape: f32[1,64], index: 2, kind: input, shape index: {}]   ;;  %s1193_s3 = inlined_call_operand.vmem [shape: f32[1,32], index: 3, kind: input, shape index: {}]   ;;  %s1194_s4 = inlined_call_operand.hbm [shape: f32[1,32], index: 4, kind: input, shape index: {}]   ;;  %s1195_s5 = inlined_call_operand.vmem [shape: f32[32,32], index: 5, kind: input, shape index: {}]   ;;  %s1196_s6 = inlined_call_operand.hbm [shape: f32[1,32], index: 6, kind: input, shape index: {}]   ;;  %s1197_s7 = inlined_call_operand.vmem [shape: f32[32,49], index: 7, kind: input, shape index: {}]   ;;  %s1198_s8 = inlined_call_operand.hbm [shape: f32[1,49], index: 8, kind: input, shape index: {}]   ;;  %s1199_s9 = inlined_call_operand.hbm [shape: f32[1,32], index: 9, kind: input, shape index: {}]   ;;  %s1200_s10 = inlined_call_operand.hbm [shape: f32[1,32], index: 10, kind: input, shape index: {}]   ;;  %s1201_s11 = inlined_call_operand.vmem [shape: f32[32,16], index: 11, kind: input, shape index: {}]   ;;  %s1202_s12 = inlined_call_operand.hbm [shape: f32[1,16], index: 12, kind: input, shape index: {}]   ;;  %s1203_s13 = inlined_call_operand.hbm [shape: f32[8,16], index: 13, kind: output, shape index: {0}]   ;;  %s1204_s14 = inlined_call_operand.vmem [shape: f32[8,1], index: 14, kind: output, shape index: {1}]  }
   0x1   :  { %21 = vsyncpa [#allocation6], 0 }
   0x2   :  { %22 = vsyncpa [#allocation9], 0 }
   0x3   :  { %23 = vsyncpa [#allocation12], 0 }
   0x4   :  { %24 = vsyncpa [#allocation15], 0 }
   0x5   :  { %25 = vsyncpa [#allocation4], 0  ;;  %s917_s29 = smov [#allocation5]   ;;  %s707_s17 = scalar_lea.hbm %s1191_s1, 256 }
   0x6   :  { %s41_s30 = sshll.u32 %s917_s29, 4  ;;  %p708_p0 = scmp.ne.s32.totalorder %s1191_s1, %s707_s17  ;;  %s42_s30 = int_to_ptr.vmem [resolvable:$true] %s41_s30 }
   0x7   :  { %p711_p1 = scmp.lt.u32.totalorder %s707_s17, %s1191_s1 }
   0x9   :  { %p713_p2 = pnand %p711_p1, %p708_p0 }
   0xb   :  { %716 = shalt.err (!%p713_p2)
}
   0xc   :  { %s717_s22 = scalar_lea.vmem %s42_s30, 256  ;;  %p722_p4 = scmp.lt.s32.totalorder %s42_s30, %s42_s30 }
   0xd   :  { %p718_p3 = scmp.ne.s32.totalorder %s42_s30, %s717_s22  ;;  %p723_p5 = scmp.lt.s32.totalorder %s717_s22, %s717_s22 }
   0xf   :  { %p724_p6 = por %p723_p5, %p722_p4 }
  0x11   :  { %p725_p7 = pnand %p724_p6, %p718_p3 }
  0x13   :  { %728 = shalt.err (!%p725_p7)
}
  0x14   :  { %s918_s23 = smov 128   ;;  %s919_s24 = smov 8  }
  0x15   :  { %47 = dma.hbm_to_vmem [thread:$0]  %s1191_s1, 256, %s42_s30, [#allocation6], %s918_s23, %s918_s23, %s919_s24  }
  0x16   :  { %s920_s27 = smov [#allocation8]   ;;  %s921_s29 = smov [#allocation11]  }
  0x17   :  { %s70_s28 = sshll.u32 %s920_s27, 4  ;;  %s92_s15 = sshll.u32 %s921_s29, 4  ;;  %s71_s28 = int_to_ptr.vmem [resolvable:$true] %s70_s28  ;;  %s93_s15 = int_to_ptr.vmem [resolvable:$true] %s92_s15 }
  0x18   :  { %s729_s18 = scalar_lea.hbm %s1196_s6, 16 }
  0x19   :  { %p730_p8 = scmp.ne.s32.totalorder %s1196_s6, %s729_s18  ;;  %p733_p9 = scmp.lt.u32.totalorder %s729_s18, %s1196_s6 }
  0x1b   :  { %p735_p10 = pnand %p733_p9, %p730_p8 }
  0x1d   :  { %738 = shalt.err (!%p735_p10)
}
  0x1e   :  { %s739_s1 = scalar_lea.vmem %s71_s28, 16  ;;  %s743_s30 = scalar_lea.vmem %s71_s28, 32 }
  0x1f   :  { %p740_p11 = scmp.ne.s32.totalorder %s71_s28, %s739_s1  ;;  %p744_p12 = scmp.lt.s32.totalorder %s71_s28, %s71_s28 }
  0x20   :  { %p745_p13 = scmp.lt.s32.totalorder %s743_s30, %s739_s1 }
  0x22   :  { %p746_p0 = por %p745_p13, %p744_p12 }
  0x24   :  { %p747_p1 = pnand %p746_p0, %p740_p11 }
  0x26   :  { %750 = shalt.err (!%p747_p1)
}
  0x27   :  { %73 = dma.hbm_to_vmem [thread:$0]  %s1196_s6, 16, %s71_s28, [#allocation9]  }
  0x28   :  { %s751_s27 = scalar_lea.hbm %s1199_s9, 16 }
  0x29   :  { %p752_p2 = scmp.ne.s32.totalorder %s1199_s9, %s751_s27  ;;  %p755_p3 = scmp.lt.u32.totalorder %s751_s27, %s1199_s9 }
  0x2b   :  { %p757_p4 = pnand %p755_p3, %p752_p2 }
  0x2d   :  { %760 = shalt.err (!%p757_p4)
}
  0x2e   :  { %s761_s19 = scalar_lea.vmem %s93_s15, 16  ;;  %s765_s20 = scalar_lea.vmem %s93_s15, 32 }
  0x2f   :  { %p762_p5 = scmp.ne.s32.totalorder %s93_s15, %s761_s19  ;;  %p766_p6 = scmp.lt.s32.totalorder %s93_s15, %s93_s15 }
  0x30   :  { %p767_p7 = scmp.lt.s32.totalorder %s765_s20, %s761_s19 }
  0x32   :  { %p768_p8 = por %p767_p7, %p766_p6 }
  0x34   :  { %p769_p9 = pnand %p768_p8, %p762_p5 }
  0x36   :  { %772 = shalt.err (!%p769_p9)
}
  0x37   :  { %95 = dma.hbm_to_vmem [thread:$0]  %s1199_s9, 16, %s93_s15, [#allocation12]  }
  0x38   :  { %s922_s21 = smov [#allocation2]   ;;  %s923_s1 = smov [#allocation7]  }
  0x39   :  { %s32_s22 = sshll.u32 %s922_s21, 4  ;;  %s58_s30 = sshll.u32 %s923_s1, 4  ;;  %s33_s22 = int_to_ptr.vmem [resolvable:$true] %s32_s22  ;;  %s59_s30 = int_to_ptr.vmem [resolvable:$true] %s58_s30 }
  0x3a   :  { %s773_s25 = scalar_lea.hbm %s1190_s0, 128 }
  0x3b   :  { %p774_p10 = scmp.ne.s32.totalorder %s1190_s0, %s773_s25  ;;  %p777_p11 = scmp.lt.u32.totalorder %s773_s25, %s1190_s0 }
  0x3d   :  { %p779_p12 = pnand %p777_p11, %p774_p10 }
  0x3f   :  { %782 = shalt.err (!%p779_p12)
}
  0x40   :  { %s783_s9 = scalar_lea.vmem %s33_s22, 128  ;;  %p788_p0 = scmp.lt.s32.totalorder %s33_s22, %s33_s22 }
  0x41   :  { %p784_p13 = scmp.ne.s32.totalorder %s33_s22, %s783_s9  ;;  %p789_p1 = scmp.lt.s32.totalorder %s783_s9, %s783_s9 }
  0x43   :  { %p790_p2 = por %p789_p1, %p788_p0 }
  0x45   :  { %p791_p3 = pnand %p790_p2, %p784_p13 }
  0x47   :  { %794 = shalt.err (!%p791_p3)
}
  0x48   :  { %35 = dma.hbm_to_vmem [thread:$0]  %s1190_s0, 128, %s33_s22, [#allocation3]  }
  0x49   :  { %s795_s20 = scalar_lea.hbm %s1194_s4, 16 }
  0x4a   :  { %p796_p4 = scmp.ne.s32.totalorder %s1194_s4, %s795_s20  ;;  %p799_p5 = scmp.lt.u32.totalorder %s795_s20, %s1194_s4 }
  0x4c   :  { %p801_p6 = pnand %p799_p5, %p796_p4 }
  0x4e   :  { %804 = shalt.err (!%p801_p6)
}
  0x4f   :  { %s805_s23 = scalar_lea.vmem %s59_s30, 16  ;;  %s809_s24 = scalar_lea.vmem %s59_s30, 32 }
  0x50   :  { %p806_p7 = scmp.ne.s32.totalorder %s59_s30, %s805_s23  ;;  %p810_p8 = scmp.lt.s32.totalorder %s59_s30, %s59_s30 }
  0x51   :  { %p811_p9 = scmp.lt.s32.totalorder %s809_s24, %s805_s23 }
  0x53   :  { %p812_p10 = por %p811_p9, %p810_p8 }
  0x55   :  { %p813_p11 = pnand %p812_p10, %p806_p7 }
  0x57   :  { %816 = shalt.err (!%p813_p11)
}
  0x58   :  { %61 = dma.hbm_to_vmem [thread:$0]  %s1194_s4, 16, %s59_s30, [#allocation6]  }
  0x59   :  { %s924_s25 = smov [#allocation10]   ;;  %s925_s27 = smov [#allocation13]  }
  0x5a   :  { %s82_s26 = sshll.u32 %s924_s25, 4  ;;  %s102_s29 = sshll.u32 %s925_s27, 4  ;;  %s83_s26 = int_to_ptr.vmem [resolvable:$true] %s82_s26  ;;  %s103_s29 = int_to_ptr.vmem [resolvable:$true] %s102_s29 }
  0x5b   :  { %s817_s15 = scalar_lea.hbm %s1198_s8, 16 }
  0x5c   :  { %p818_p12 = scmp.ne.s32.totalorder %s1198_s8, %s817_s15  ;;  %p821_p13 = scmp.lt.u32.totalorder %s817_s15, %s1198_s8 }
  0x5e   :  { %p823_p0 = pnand %p821_p13, %p818_p12 }
  0x60   :  { %826 = shalt.err (!%p823_p0)
}
  0x61   :  { %s827_s4 = scalar_lea.vmem %s83_s26, 16  ;;  %s831_s30 = scalar_lea.vmem %s83_s26, 32 }
  0x62   :  { %p828_p1 = scmp.ne.s32.totalorder %s83_s26, %s827_s4  ;;  %p832_p2 = scmp.lt.s32.totalorder %s83_s26, %s83_s26 }
  0x63   :  { %p833_p3 = scmp.lt.s32.totalorder %s831_s30, %s827_s4 }
  0x65   :  { %p834_p4 = por %p833_p3, %p832_p2 }
  0x67   :  { %p835_p5 = pnand %p834_p4, %p828_p1 }
  0x69   :  { %838 = shalt.err (!%p835_p5)
}
  0x6a   :  { %85 = dma.hbm_to_vmem [thread:$0]  %s1198_s8, 16, %s83_s26, [#allocation9]  }
  0x6b   :  { %s839_s23 = scalar_lea.hbm %s1200_s10, 16 }
  0x6c   :  { %p840_p6 = scmp.ne.s32.totalorder %s1200_s10, %s839_s23  ;;  %p843_p7 = scmp.lt.u32.totalorder %s839_s23, %s1200_s10 }
  0x6e   :  { %p845_p8 = pnand %p843_p7, %p840_p6 }
  0x70   :  { %848 = shalt.err (!%p845_p8)
}
  0x71   :  { %s849_s27 = scalar_lea.vmem %s103_s29, 16  ;;  %s853_s16 = scalar_lea.vmem %s103_s29, 32 }
  0x72   :  { %p850_p9 = scmp.ne.s32.totalorder %s103_s29, %s849_s27  ;;  %p854_p10 = scmp.lt.s32.totalorder %s103_s29, %s103_s29 }
  0x73   :  { %p855_p11 = scmp.lt.s32.totalorder %s853_s16, %s849_s27 }
  0x75   :  { %p856_p12 = por %p855_p11, %p854_p10 }
  0x77   :  { %p857_p13 = pnand %p856_p12, %p850_p9 }
  0x79   :  { %860 = shalt.err (!%p857_p13)
}
  0x7a   :  { %105 = dma.hbm_to_vmem [thread:$0]  %s1200_s10, 16, %s103_s29, [#allocation12]  }
  0x7b   :  { %s926_s9 = smov [#allocation14]   ;;  %s861_s19 = scalar_lea.hbm %s1202_s12, 16 }
  0x7c   :  { %s114_s15 = sshll.u32 %s926_s9, 4  ;;  %p862_p0 = scmp.ne.s32.totalorder %s1202_s12, %s861_s19  ;;  %s115_s15 = int_to_ptr.vmem [resolvable:$true] %s114_s15 }
  0x7d   :  { %p865_p1 = scmp.lt.u32.totalorder %s861_s19, %s1202_s12 }
  0x7f   :  { %p867_p2 = pnand %p865_p1, %p862_p0 }
  0x81   :  { %870 = shalt.err (!%p867_p2)
}
  0x82   :  { %s871_s28 = scalar_lea.vmem %s115_s15, 16  ;;  %s875_s10 = scalar_lea.vmem %s115_s15, 32 }
  0x83   :  { %p872_p3 = scmp.ne.s32.totalorder %s115_s15, %s871_s28  ;;  %p876_p4 = scmp.lt.s32.totalorder %s115_s15, %s115_s15 }
  0x84   :  { %p877_p5 = scmp.lt.s32.totalorder %s875_s10, %s871_s28 }
  0x86   :  { %p878_p6 = por %p877_p5, %p876_p4 }
  0x88   :  { %p879_p7 = pnand %p878_p6, %p872_p3 }
  0x8a   :  { %882 = shalt.err (!%p879_p7)
}
  0x8b   :  { %117 = dma.hbm_to_vmem [thread:$0]  %s1202_s12, 16, %s115_s15, [#allocation15]  }
  0x8c   :  { %905 = dma.done.wait [#allocation3], 128  }
  0x8d   :  { %906 = vsyncadd [#allocation3], 4294967168 }
  0x8e   :  { %907 = dma.done.wait [#allocation6], 272  }
  0x8f   :  { %908 = vsyncadd [#allocation6], 4294967024 }
  0x90   :  { %909 = dma.done.wait [#allocation9], 32  }
  0x91   :  { %910 = vsyncadd [#allocation9], 4294967264 }
  0x92   :  { %911 = dma.done.wait [#allocation12], 32  }
  0x93   :  { %912 = vsyncadd [#allocation12], 4294967264 }
  0x94   :  { %913 = dma.done.wait [#allocation15], 16  }
  0x95   :  { %914 = vsyncadd [#allocation15], 4294967280  ;;  %v927_v0 = vmov 0.0|0.0   ;;  %vm928_vm0 = vmmov 0   ;;  %v929_v1 = vmov 0.0   ;;  %v143_v2 = vld [vmem:[#allocation5] sm:$0xff]  ;;  %v253_v36 = vlaneseq }
  0x96   :  { %664 = vmatprep.subr.bf16.mxu0 %v927_v0  ;;  %628 = vmatprep.mubr.msk.f32.mxu0 %vm928_vm0, %v929_v1  ;;  %v144_v3 = vld [vmem:[#allocation5 + $0x8] sm:$0xff]  ;;  %v142_v5 = vld [vmem:[#allocation2] sm:$0xff]  ;;  %vm152_vm1 = vcmask 130048   ;;  %v267_v7 = vld [vmem:[%s1195_s5 + $0x8] sm:$0xff]  ;;  %vm229_vm2 = vcmask 261120   ;;  %s930_s26 = smov 96  }
  0x97   :  { %667 = vmatprep.subr.bf16.mxu1 %v927_v0  ;;  %639 = vmatprep.mubr.msk.f32.mxu1 %vm928_vm0, %v929_v1  ;;  %v665_v4 = vpack.c.bf16 %v144_v3, %v143_v2  ;;  %v266_v6 = vld [vmem:[%s1195_s5] sm:$0xff]  ;;  %v268_v9 = vld [vmem:[%s1195_s5 + $0x10] sm:$0xff]  ;;  %v269_v10 = vld [vmem:[%s1195_s5 + $0x18] sm:$0xff]  ;;  %v1131_v37 = vshrl.u32 %v253_v36, 7  ;;  %s931_s1 = smov 80   ;;  %vm445_vm3 = vcmask 7168  }
  0x98   :  { %v668_v8 = vpack.c.bf16 %v267_v7, %v266_v6  ;;  %v671_v11 = vpack.c.bf16 %v269_v10, %v268_v9  ;;  %v596_v12 = vld [vmem:[%s1192_s2] ss:$0 sm:$0xff]  ;;  %v598_v43 = vld [vmem:[#allocation7] ss:$0 sm:$0xff]  ;;  %v357_v47 = vld [vmem:[%s1197_s7 + $0x8] sm:$0xff]  ;;  %s932_s24 = smov [#allocation16]  }
  0x99   :  { %666 = vmatpush3.bf16.msra.mxu0 %v665_v4  ;;  %v227_v38 = vld [vmem:[%s1193_s3] sm:$0x1]  ;;  %v255_v39 = vsub.s32 0, %v1131_v37  ;;  %v358_v48 = vld [vmem:[%s1197_s7 + $0x10] sm:$0xff]  ;;  %v359_v50 = vld [vmem:[%s1197_s7 + $0x18] sm:$0xff]  ;;  %s579_s0 = sshll.u32 %s932_s24, 4  ;;  %s580_s0 = int_to_ptr.vmem [resolvable:$true] %s579_s0 }
  0x9a   :  { %673 = vmatprep.subr.bf16.mxu0 %v927_v0  ;;  %669 = vmatpush3.bf16.msra.mxu1 %v668_v8  ;;  %v356_v46 = vld [vmem:[%s1197_s7] sm:$0xff]  ;;  %v677_v51 = vpack.c.bf16 %v359_v50, %v358_v48  ;;  %v599_v52 = vld [vmem:[#allocation8] ss:$0 sm:$0xff]  ;;  %v485_v60 = vld [vmem:[%s1201_s11 + $0x8] sm:$0xff]  ;;  %s883_s22 = scalar_lea.vmem %s580_s0, 128  ;;  %p888_p9 = scmp.lt.s32.totalorder %s580_s0, %s580_s0 }
  0x9b   :  { %670 = vmatprep.subr.bf16.mxu1 %v927_v0  ;;  %v674_v49 = vpack.c.bf16 %v357_v47, %v356_v46  ;;  %v484_v59 = vld [vmem:[%s1201_s11] sm:$0xff]  ;;  %v486_v62 = vld [vmem:[%s1201_s11 + $0x10] sm:$0xff]  ;;  %v487_v63 = vld [vmem:[%s1201_s11 + $0x18] sm:$0xff]  ;;  %p884_p8 = scmp.ne.s32.totalorder %s580_s0, %s883_s22  ;;  %p889_p10 = scmp.lt.s32.totalorder %s883_s22, %s883_s22 }
  0x9c   :  { %629 = vmatmul.mubr.msk.f32.vlgmr.msra.gmra.mrb[0].mxu0 %vm152_vm1, %v142_v5  ;;  %v680_v61 = vpack.c.bf16 %v485_v60, %v484_v59  ;;  %v601_v2 = vld [vmem:[#allocation10] ss:$0 sm:$0xff] }
  0x9d   :  { %650 = vmatprep.mubr.msk.f32.mxu0 %vm928_vm0, %v929_v1  ;;  %675 = vmatpush3.bf16.msra.mxu0 %v674_v49  ;;  %p890_p11 = por %p889_p10, %p888_p9 }
  0x9e   :  { %672 = vmatpush3.bf16.msra.mxu1 %v671_v11  ;;  %676 = vmatprep.subr.bf16.mxu0 %v927_v0 }
  0x9f   :  { %679 = vmatprep.subr.bf16.mxu1 %v927_v0  ;;  %p891_p12 = pnand %p890_p11, %p884_p8 }
  0xa1   :  { %678 = vmatpush3.bf16.msra.mxu0 %v677_v51 }
 0x16f   :  { %v222_v13 = vpop.f32.mrb[0].mxu0 }
 0x170   :  { %v223_v14 = vadd.f32 %v596_v12, %v222_v13  ;;  %v630_v15 = vpop.f32.mrb[1].mxu0 }
 0x172   :  { %v226_v16 = vmax.f32 %v223_v14, 0.0  ;;  %351 = vrot.lane.b32.xlu0 %v223_v14, %s930_s26 }
 0x174   :  { %v230_v17 = vsel %vm229_vm2, %v226_v16, 0.0 }
 0x175   :  { %v231_v18 = vrot.slane %v230_v17, 4 }
 0x177   :  { %v232_v19 = vadd.f32 %v231_v18, %v230_v17 }
 0x179   :  { %v233_v20 = vrot.slane %v232_v19, 2 }
 0x17b   :  { %v234_v21 = vadd.f32 %v233_v20, %v232_v19 }
 0x17d   :  { %v235_v22 = vrot.slane %v234_v21, 1 }
 0x17f   :  { %v236_v23 = vadd.f32 %v235_v22, %v234_v21 }
 0x181   :  { %v238_v24 = vmul.f32 0.125, %v236_v23 }
 0x183   :  { %v239_v25 = vsub.f32 %v226_v16, %v238_v24 }
 0x185   :  { %v240_v26 = vmul.f32 %v239_v25, %v239_v25 }
 0x187   :  { %v241_v27 = vsel %vm229_vm2, %v240_v26, 0.0 }
 0x188   :  { %v242_v28 = vrot.slane %v241_v27, 4 }
 0x18a   :  { %v243_v29 = vadd.f32 %v242_v28, %v241_v27 }
 0x18c   :  { %v244_v30 = vrot.slane %v243_v29, 2 }
 0x18e   :  { %v245_v31 = vadd.f32 %v244_v30, %v243_v29  ;;  %v603_v29 = vld [vmem:[#allocation13] ss:$0 sm:$0xff] }
 0x190   :  { %v246_v32 = vrot.slane %v245_v31, 1 }
 0x192   :  { %v247_v33 = vadd.f32 %v246_v32, %v245_v31 }
 0x194   :  { %v248_v34 = vmul.f32 0.125, %v247_v33  ;;  %v604_v33 = vld [vmem:[#allocation14] ss:$0 sm:$0xff] }
 0x196   :  { %v249_v35 = vadd.f32 1e-05, %v248_v34 }
 0x198   :  { %701 = vrsqrt.f32 %v249_v35 }
 0x1a2   :  { %v702_v40 = vpop.eup %701 }
 0x1a3   :  { %v251_v41 = vmul.f32 %v702_v40, %v227_v38 }
 0x1a5   :  { %v256_v42 = vrot.slane %v251_v41, %v255_v39 }
 0x1a7   :  { %v258_v44 = vmul.f32 %v256_v42, %v239_v25  ;;  %v447_v25 = vld [vmem:[#allocation11] sm:$0x1] }
 0x1a9   :  { %v265_v45 = vadd.f32 %v598_v43, %v258_v44 }
 0x1ab   :  { %640 = vmatmul.mubr.msk.f32.vlgmr.msra.gmra.mrb[0].mxu1 %vm229_vm2, %v265_v45 }
 0x1ac   :  { %661 = vmatprep.mubr.msk.f32.mxu1 %vm928_vm0, %v929_v1  ;;  %681 = vmatpush3.bf16.msra.mxu1 %v680_v61  ;;  %v683_v1 = vpack.c.bf16 %v487_v63, %v486_v62 }
 0x1ad   :  { %682 = vmatprep.subr.bf16.mxu1 %v927_v0 }
 0x1b0   :  { %684 = vmatpush3.bf16.msra.mxu1 %v683_v1 }
 0x1e4   :  { %v352_v56 = vpop.permute.xlu0 %351 }
 0x27e   :  { %v346_v53 = vpop.f32.mrb[0].mxu1 }
 0x27f   :  { %v347_v54 = vadd.f32 %v599_v52, %v346_v53  ;;  %v641_v55 = vpop.f32.mrb[1].mxu1 }
 0x281   :  { %v354_v57 = vadd.f32 %v352_v56, %v347_v54 }
 0x283   :  { %703 = vtanh.f32 %v354_v57 }
 0x28d   :  { %v704_v58 = vpop.eup %703 }
 0x28e   :  { %651 = vmatmul.mubr.msk.f32.vlgmr.msra.gmra.mrb[2].mxu0 %vm229_vm2, %v704_v58 }
 0x361   :  { %v436_v3 = vpop.f32.mrb[2].mxu0 }
 0x362   :  { %v437_v4 = vadd.f32 %v601_v2, %v436_v3  ;;  %v652_v5 = vpop.f32.mrb[3].mxu0 }
 0x364   :  { %v440_v6 = vmax.f32 %v437_v4, 0.0  ;;  %442 = vrot.lane.b32.xlu1 %v437_v4, %s931_s1  ;;  %568 = vrot.lane.b32.xlu0 %v437_v4, %s930_s26 }
 0x366   :  { %v449_v0 = vsel %vm229_vm2, %v440_v6, 0.0 }
 0x367   :  { %v450_v7 = vrot.slane %v449_v0, 4 }
 0x369   :  { %v451_v8 = vadd.f32 %v450_v7, %v449_v0 }
 0x36b   :  { %v452_v9 = vrot.slane %v451_v8, 2 }
 0x36d   :  { %v453_v10 = vadd.f32 %v452_v9, %v451_v8 }
 0x36f   :  { %v454_v11 = vrot.slane %v453_v10, 1 }
 0x371   :  { %v455_v12 = vadd.f32 %v454_v11, %v453_v10 }
 0x373   :  { %v456_v13 = vmul.f32 0.125, %v455_v12 }
 0x375   :  { %v457_v14 = vsub.f32 %v440_v6, %v456_v13 }
 0x377   :  { %v458_v15 = vmul.f32 %v457_v14, %v457_v14 }
 0x379   :  { %v459_v16 = vsel %vm229_vm2, %v458_v15, 0.0 }
 0x37a   :  { %v460_v17 = vrot.slane %v459_v16, 4 }
 0x37c   :  { %v461_v18 = vadd.f32 %v460_v17, %v459_v16 }
 0x37e   :  { %v462_v19 = vrot.slane %v461_v18, 2 }
 0x380   :  { %v463_v20 = vadd.f32 %v462_v19, %v461_v18 }
 0x382   :  { %v464_v21 = vrot.slane %v463_v20, 1 }
 0x384   :  { %v465_v22 = vadd.f32 %v464_v21, %v463_v20 }
 0x386   :  { %v466_v23 = vmul.f32 0.125, %v465_v22 }
 0x388   :  { %v467_v24 = vadd.f32 1e-05, %v466_v23 }
 0x38a   :  { %705 = vrsqrt.f32 %v467_v24 }
 0x394   :  { %v706_v26 = vpop.eup %705 }
 0x395   :  { %v469_v27 = vmul.f32 %v706_v26, %v447_v25 }
 0x397   :  { %v474_v28 = vrot.slane %v469_v27, %v255_v39 }
 0x399   :  { %v476_v30 = vmul.f32 %v474_v28, %v457_v14 }
 0x39b   :  { %v483_v31 = vadd.f32 %v603_v29, %v476_v30 }
 0x39d   :  { %662 = vmatmul.mubr.msk.f32.vlgmr.msra.gmra.mrb[2].mxu1 %vm229_vm2, %v483_v31 }
 0x3d6   :  { %v443_v32 = vpop.permute.xlu1 %442  ;;  %v569_v38 = vpop.permute.xlu0 %568 }
 0x3d7   :  { %446 = vst.msk [vmem:[%s1204_s14] sm:$0xff] %vm445_vm3, %v443_v32 }
 0x470   :  { %v564_v34 = vpop.f32.mrb[2].mxu1 }
 0x471   :  { %v565_v35 = vadd.f32 %v604_v33, %v564_v34  ;;  %v663_v36 = vpop.f32.mrb[3].mxu1 }
 0x473   :  { %v571_v37 = vadd.f32 %v569_v38, %v565_v35 }
 0x475   :  { %572 = vst.msk [vmem:[#allocation16] sm:$0xff] %vm152_vm1, %v571_v37 }
 0x476   :  { %894 = shalt.err (!%p891_p12)
}
 0x477   :  { %s895_s27 = scalar_lea.hbm %s1203_s13, 128 }
 0x478   :  { %p896_p13 = scmp.ne.s32.totalorder %s1203_s13, %s895_s27  ;;  %p899_p0 = scmp.lt.u32.totalorder %s895_s27, %s1203_s13 }
 0x47a   :  { %p901_p1 = pnand %p899_p0, %p896_p13 }
 0x47c   :  { %904 = shalt.err (!%p901_p1)
}
 0x47d   :  { %582 = dma.vmem_to_hbm [thread:$0]  %s580_s0, 128, %s1203_s13, [#allocation4]  }
 0x47e   :  { %915 = dma.done.wait [#allocation4], 128  }
 0x47f   :  { %916 = vsyncadd [#allocation4], 4294967168 }
 0x480   :  { %590 = vsyncpa [#allocation3], 1 }
 0x481   :  { %591 = vsyncpa [#allocation6], 1 }
 0x482   :  { %592 = vsyncpa [#allocation9], 1 }
 0x483   :  { %593 = vsyncpa [#allocation12], 1 }
 0x484   :  { %594 = vsyncpa [#allocation15], 1 }
 0x485   :  { %595 = vsyncpa [#allocation4], 1 }

</bundles_post_ra>
